<compile_context>
chip_gen: v5e
topology: v5e:2x2
jax: 0.10.0
libtpu: 0.0.40
codegen_flags: <defaults>
</compile_context>

<pallas_src>
import math
import functools

import jax
import jax.numpy as jnp
from jax import lax
from jax.experimental import pallas as pl
from jax.experimental.pallas import tpu as pltpu


def _gelu(x, approximate):
    if approximate:
        # tanh approximation: the transcendental goes to the EUP slot instead
        # of a long VALU erf polynomial (use if numerics allow).
        c = math.sqrt(2.0 / math.pi)
        return 0.5 * x * (1.0 + jnp.tanh(c * (x + 0.044715 * (x * x * x))))
    # exact erf-based GELU, matching the torch reference.
    return x * 0.5 * (1.0 + lax.erf(x * (1.0 / math.sqrt(2.0))))


def pollute_linear_kernel(x_ref, w1_ref, b1_ref, gw2_ref, c0_ref,
                          out_ref, acc_ref, *, eps, approximate_gelu):
    k = pl.program_id(1)
    last_k = pl.num_programs(1) - 1

    # dense matmul chunk: (TM, TK) @ (TK, H) on the MXU, f32 accumulate.
    partial_acc = jnp.dot(x_ref[...], w1_ref[...],
                          preferred_element_type=jnp.float32)

    @pl.when(k == 0)
    def _():
        acc_ref[...] = partial_acc

    @pl.when(k != 0)
    def _():
        acc_ref[...] += partial_acc

    @pl.when(k == last_k)
    def _():
        h = acc_ref[...] + b1_ref[...]
        h = _gelu(h, approximate_gelu)

        # BertLayerNorm statistics over the hidden dim (biased variance,
        # eps inside rsqrt), in f32.
        mean = jnp.mean(h, axis=-1, keepdims=True)
        centered = h - mean
        var = jnp.mean(centered * centered, axis=-1, keepdims=True)

        # Folded LN-affine + decoder:
        #   sum(((centered * rsqrt(var+eps)) * gamma + beta) * w2) + b2
        # = rsqrt(var+eps) * sum(centered * (gamma*w2)) + (sum(beta*w2) + b2)
        proj = jnp.sum(centered * gw2_ref[...], axis=-1, keepdims=True)
        out = lax.rsqrt(var + eps) * proj + c0_ref[0]

        # natural (TM, 1) per-sublane store; output traffic is negligible.
        out_ref[...] = out.astype(out_ref.dtype)


def _round_up(n, m):
    return ((n + m - 1) // m) * m


def pollute_linear(x2d, w1, b1, gamma, beta, w2, b2, *, eps=1e-12,
                   tm=512, k_block=512, max_single_k=1024,
                   matmul_dtype=jnp.bfloat16, approximate_gelu=False):
    """x2d: (N, D_in).  w1: (D_in, H).  Returns (N, 1) float32."""
    N, D_in = x2d.shape
    H = w1.shape[1]

    # --- row (M) tiling: don't use a tile bigger than (padded) N. ------------
    tm = min(tm, _round_up(N, 16))
    tm = max(16, _round_up(tm, 16))          # 16-row multiple (bf16 sublane pack)
    num_tiles = pl.cdiv(N, tm)
    n_pad = num_tiles * tm

    # --- reduction (K) tiling over input_size. --------------------------------
    k_block = _round_up(k_block, 128)        # lane-aligned K chunks
    if D_in <= max_single_k:
        tk, num_k, d_pad = D_in, 1, D_in
    else:
        tk = k_block
        d_pad = _round_up(D_in, tk)
        num_k = d_pad // tk

    # --- cast / pad operands (zero padding is exact: padded rows are sliced
    # off and padded K columns multiply zero weight rows). ---------------------
    x2d = x2d.astype(matmul_dtype)
    w1 = w1.astype(matmul_dtype)
    if n_pad != N or d_pad != D_in:
        x2d = jnp.pad(x2d, ((0, n_pad - N), (0, d_pad - D_in)))
    if d_pad != D_in:
        w1 = jnp.pad(w1, ((0, d_pad - D_in), (0, 0)))

    b1 = b1.reshape(1, H).astype(jnp.float32)
    # Fold LayerNorm affine + decoder: gw2 = gamma*w2, c0 = sum(beta*w2) + b2.
    w2v = w2.reshape(-1).astype(jnp.float32)
    gw2 = (gamma.reshape(-1).astype(jnp.float32) * w2v).reshape(1, H)
    c0 = (jnp.sum(beta.reshape(-1).astype(jnp.float32) * w2v)
          + b2.reshape(-1).astype(jnp.float32)[0]).reshape(1)

    # --- explicit VMEM budget (instead of the scoped default). ----------------
    itm = jnp.dtype(matmul_dtype).itemsize
    w1_bufs = 1 if num_k == 1 else 2
    vmem_bytes = (
        2 * tm * tk * itm          # x tiles (double-buffered)
        + w1_bufs * tk * H * itm   # dense-weight tiles
        + 2 * H * 4                # b1 + gw2 (single-buffered)
        + tm * H * 4               # f32 accumulator scratch
        + 6 * tm * H * 4           # epilogue temporaries (GELU / LN)
        + 2 * tm * 4               # output tiles
    )
    vmem_limit = max(16 * 1024 * 1024,
                     min(int(vmem_bytes * 1.5), 64 * 1024 * 1024))

    kernel = functools.partial(pollute_linear_kernel, eps=eps,
                               approximate_gelu=approximate_gelu)

    cost = pl.CostEstimate(
        flops=2 * n_pad * d_pad * H + 12 * n_pad * H,
        transcendentals=n_pad * H + n_pad,
        bytes_accessed=(n_pad * d_pad * itm + d_pad * H * itm
                        + 8 * H + n_pad * 4),
    )

    # W1 is constant across the grid only when it isn't K-tiled; in that case
    # single-buffer it to reclaim VMEM for the row tile.
    if num_k == 1:
        w1_spec = pl.BlockSpec((tk, H), lambda i, k: (k, 0),
                               pipeline_mode=pl.Buffered(1))
    else:
        w1_spec = pl.BlockSpec((tk, H), lambda i, k: (k, 0))

    out = pl.pallas_call(
        kernel,
        out_shape=jax.ShapeDtypeStruct((n_pad, 1), jnp.float32),
        grid_spec=pltpu.PrefetchScalarGridSpec(
            num_scalar_prefetch=0,
            grid=(num_tiles, num_k),
            in_specs=[
                pl.BlockSpec((tm, tk), lambda i, k: (i, k)),           # x rows
                w1_spec,                                               # dense weight
                pl.BlockSpec((1, H), lambda i, k: (0, 0),
                             pipeline_mode=pl.Buffered(1)),            # dense bias
                pl.BlockSpec((1, H), lambda i, k: (0, 0),
                             pipeline_mode=pl.Buffered(1)),            # gamma*w2
                pl.BlockSpec(memory_space=pltpu.MemorySpace.SMEM),     # folded scalar
            ],
            out_specs=pl.BlockSpec((tm, 1), lambda i, k: (i, 0)),
            scratch_shapes=[pltpu.VMEM((tm, H), jnp.float32)],
        ),
        compiler_params=pltpu.CompilerParams(
            dimension_semantics=("parallel", "arbitrary"),
            vmem_limit_bytes=vmem_limit,
        ),
        cost_estimate=cost,
    )(x2d, w1, b1, gw2, c0)

    return out[:N]


def pollute_linear_ref(x2d, w1, b1, gamma, beta, w2, b2, eps=1e-12):
    """Pure-JAX fp32 reference of the torch forward (exact erf-GELU)."""
    h = x2d @ w1 + b1.reshape(1, -1)
    h = h * 0.5 * (1.0 + lax.erf(h / math.sqrt(2.0)))
    mean = jnp.mean(h, axis=-1, keepdims=True)
    c = h - mean
    var = jnp.mean(c * c, axis=-1, keepdims=True)
    hn = c * lax.rsqrt(var + eps) * gamma.reshape(1, -1) + beta.reshape(1, -1)
    return hn @ w2.reshape(-1, 1) + b2.reshape(1, 1)


if __name__ == "__main__":
    # Small shapes consistent with the module (Linear -> GELU -> LN -> Linear(->1)).
    batch, seq = 2, 8
    input_size, hidden_size = 256, 128
    N = batch * seq

    key = jax.random.PRNGKey(0)
    kx, kw1, kb1, kg, kb, kw2, kb2 = jax.random.split(key, 7)

    x = jax.random.normal(kx, (batch, seq, input_size), dtype=jnp.float32)

    # Deterministic synthetic parameters (non-trivial gamma/beta so the LN fold
    # is actually exercised).
    w1 = jax.random.normal(kw1, (input_size, hidden_size), dtype=jnp.float32) * 0.05
    b1 = jax.random.normal(kb1, (hidden_size,), dtype=jnp.float32) * 0.01
    gamma = 1.0 + 0.1 * jax.random.normal(kg, (hidden_size,), dtype=jnp.float32)
    beta = 0.05 * jax.random.normal(kb, (hidden_size,), dtype=jnp.float32)
    w2 = jax.random.normal(kw2, (hidden_size, 1), dtype=jnp.float32) * 0.05
    b2 = jax.random.normal(kb2, (1,), dtype=jnp.float32) * 0.01

    x2d = x.reshape(N, input_size)
    ref = pollute_linear_ref(x2d, w1, b1, gamma, beta, w2, b2)

    # (1) default path: single K block (input_size <= max_single_k).
    out1 = pollute_linear(x2d, w1, b1, gamma, beta, w2, b2)
    jax.block_until_ready(out1)

    # (2) force the K-tiled path (two 128-wide chunks) on the same inputs.
    out2 = pollute_linear(x2d, w1, b1, gamma, beta, w2, b2,
                          max_single_k=128, k_block=128)
    jax.block_until_ready(out2)

    # bf16 matmul operands with f32 accumulation -> loosened tolerance vs fp32.
    for o in (out1, out2):
        err = jnp.max(jnp.abs(o - ref))
        assert jnp.allclose(o, ref, atol=3e-2, rtol=3e-2), f"max abs err {err}"
    # The two kernel paths use identical bf16 operands and must agree tightly.
    err12 = jnp.max(jnp.abs(out1 - out2))
    assert jnp.allclose(out1, out2, atol=1e-3, rtol=1e-3), f"path mismatch {err12}"

    out = out1.reshape(batch, seq, 1)
    jax.block_until_ready(out)
    print("KERNEL_OK")
</pallas_src>

<mosaic_0001>
module attributes {stable_mosaic.version = 11 : i64} {
  func.func @pollute_linear_kernel(%arg0: i32, %arg1: i32, %arg2: memref<16x256xbf16, #tpu.memory_space<vmem>>, %arg3: memref<256x128xbf16, #tpu.memory_space<vmem>>, %arg4: memref<1x128xf32, #tpu.memory_space<vmem>>, %arg5: memref<1x128xf32, #tpu.memory_space<vmem>>, %arg6: memref<1xf32, #tpu.memory_space<smem>>, %arg7: memref<16x1xf32, #tpu.memory_space<vmem>>, %arg8: memref<16x128xf32, #tpu.memory_space<vmem>>) attributes {dimension_semantics = [#tpu.dimension_semantics<parallel>, #tpu.dimension_semantics<arbitrary>], iteration_bounds = array<i64: 1, 1>, scalar_prefetch = 0 : i64, scratch_operands = 1 : i64, tpu.core_type = #tpu.core_type<tc>, window_params = [{transform_indices = @transform_0, window_bounds = array<i64: 16, 256>}, {pipeline_mode = #tpu.pipeline_mode<synchronous>, transform_indices = @transform_1, window_bounds = array<i64: 256, 128>}, {pipeline_mode = #tpu.pipeline_mode<synchronous>, transform_indices = @transform_2, window_bounds = array<i64: 1, 128>}, {pipeline_mode = #tpu.pipeline_mode<synchronous>, transform_indices = @transform_3, window_bounds = array<i64: 1, 128>}, {transform_indices = @transform_4, window_bounds = array<i64: 1>}, {transform_indices = @transform_5, window_bounds = array<i64: 16, 1>}]} {
    %c0 = arith.constant 0 : index
    %c0_0 = arith.constant 0 : index
    %0 = vector.load %arg2[%c0, %c0_0] : memref<16x256xbf16, #tpu.memory_space<vmem>>, vector<16x256xbf16>
    %c0_1 = arith.constant 0 : index
    %c0_2 = arith.constant 0 : index
    %1 = vector.load %arg3[%c0_1, %c0_2] : memref<256x128xbf16, #tpu.memory_space<vmem>>, vector<256x128xbf16>
    %cst = arith.constant dense<0.000000e+00> : vector<16x128xf32>
    %2 = tpu.matmul %0, %1, %cst {dimension_numbers = #tpu.dot_dimension_numbers<[1], [0], [0], [1], [0, 0, 1, 1], [], []>} : vector<16x256xbf16>, vector<256x128xbf16>, vector<16x128xf32> -> vector<16x128xf32>
    %c0_i32 = arith.constant 0 : i32
    %3 = arith.cmpi eq, %arg1, %c0_i32 : i32
    %4 = arith.extui %3 : i1 to i32
    %c0_i32_3 = arith.constant 0 : i32
    %5 = arith.cmpi ne, %4, %c0_i32_3 : i32
    scf.if %5 {
      %c0_8 = arith.constant 0 : index
      %c0_9 = arith.constant 0 : index
      %12 = vector.load %arg8[%c0_8, %c0_9] : memref<16x128xf32, #tpu.memory_space<vmem>>, vector<16x128xf32>
      tpu.vector_store %arg8[%c0_8, %c0_9], %2 {strides = array<i32>} : memref<16x128xf32, #tpu.memory_space<vmem>>, vector<16x128xf32>,
    } else {
    }
    %c0_i32_4 = arith.constant 0 : i32
    %6 = arith.cmpi ne, %arg1, %c0_i32_4 : i32
    %7 = arith.extui %6 : i1 to i32
    %c0_i32_5 = arith.constant 0 : i32
    %8 = arith.cmpi ne, %7, %c0_i32_5 : i32
    scf.if %8 {
      %c0_8 = arith.constant 0 : index
      %c0_9 = arith.constant 0 : index
      %12 = vector.load %arg8[%c0_8, %c0_9] : memref<16x128xf32, #tpu.memory_space<vmem>>, vector<16x128xf32>
      %13 = arith.addf %12, %2 : vector<16x128xf32>
      %c0_10 = arith.constant 0 : index
      %c0_11 = arith.constant 0 : index
      %14 = vector.load %arg8[%c0_10, %c0_11] : memref<16x128xf32, #tpu.memory_space<vmem>>, vector<16x128xf32>
      tpu.vector_store %arg8[%c0_10, %c0_11], %13 {strides = array<i32>} : memref<16x128xf32, #tpu.memory_space<vmem>>, vector<16x128xf32>,
    } else {
    }
    %c0_i32_6 = arith.constant 0 : i32
    %9 = arith.cmpi eq, %arg1, %c0_i32_6 : i32
    %10 = arith.extui %9 : i1 to i32
    %c0_i32_7 = arith.constant 0 : i32
    %11 = arith.cmpi ne, %10, %c0_i32_7 : i32
    scf.if %11 {
      %c0_8 = arith.constant 0 : index
      %c0_9 = arith.constant 0 : index
      %12 = vector.load %arg8[%c0_8, %c0_9] : memref<16x128xf32, #tpu.memory_space<vmem>>, vector<16x128xf32>
      %c0_10 = arith.constant 0 : index
      %c0_11 = arith.constant 0 : index
      %13 = vector.load %arg4[%c0_10, %c0_11] : memref<1x128xf32, #tpu.memory_space<vmem>>, vector<1x128xf32>
      %14 = vector.broadcast %13 : vector<1x128xf32> to vector<16x128xf32>
      %15 = arith.addf %12, %14 : vector<16x128xf32>
      %cst_12 = arith.constant 5.000000e-01 : f32
      %16 = vector.broadcast %cst_12 : f32 to vector<16x128xf32>
      %17 = arith.mulf %15, %16 : vector<16x128xf32>
      %cst_13 = arith.constant 0.707106769 : f32
      %18 = vector.broadcast %cst_13 : f32 to vector<16x128xf32>
      %19 = arith.mulf %15, %18 : vector<16x128xf32>
      %20 = math.erf %19 : vector<16x128xf32>
      %cst_14 = arith.constant 1.000000e+00 : f32
      %21 = vector.broadcast %cst_14 : f32 to vector<16x128xf32>
      %22 = arith.addf %21, %20 : vector<16x128xf32>
      %23 = arith.mulf %17, %22 : vector<16x128xf32>
      %cst_15 = arith.constant dense<0.000000e+00> : vector<16xf32>
      %24 = vector.multi_reduction <add>, %23, %cst_15 [1] : vector<16x128xf32> to vector<16xf32>
      %25 = vector.shape_cast %24 : vector<16xf32> to vector<16x1xf32>
      %cst_16 = arith.constant 1.280000e+02 : f32
      %26 = vector.broadcast %cst_16 : f32 to vector<16x1xf32>
      %27 = arith.divf %25, %26 : vector<16x1xf32>
      %28 = vector.broadcast %27 : vector<16x1xf32> to vector<16x128xf32>
      %29 = arith.subf %23, %28 : vector<16x128xf32>
      %30 = arith.mulf %29, %29 : vector<16x128xf32>
      %cst_17 = arith.constant dense<0.000000e+00> : vector<16xf32>
      %31 = vector.multi_reduction <add>, %30, %cst_17 [1] : vector<16x128xf32> to vector<16xf32>
      %32 = vector.shape_cast %31 : vector<16xf32> to vector<16x1xf32>
      %cst_18 = arith.constant 1.280000e+02 : f32
      %33 = vector.broadcast %cst_18 : f32 to vector<16x1xf32>
      %34 = arith.divf %32, %33 : vector<16x1xf32>
      %c0_19 = arith.constant 0 : index
      %c0_20 = arith.constant 0 : index
      %35 = vector.load %arg5[%c0_19, %c0_20] : memref<1x128xf32, #tpu.memory_space<vmem>>, vector<1x128xf32>
      %36 = vector.broadcast %35 : vector<1x128xf32> to vector<16x128xf32>
      %37 = arith.mulf %29, %36 : vector<16x128xf32>
      %cst_21 = arith.constant dense<0.000000e+00> : vector<16xf32>
      %38 = vector.multi_reduction <add>, %37, %cst_21 [1] : vector<16x128xf32> to vector<16xf32>
      %39 = vector.shape_cast %38 : vector<16xf32> to vector<16x1xf32>
      %cst_22 = arith.constant 9.99999996E-13 : f32
      %40 = vector.broadcast %cst_22 : f32 to vector<16x1xf32>
      %41 = arith.addf %34, %40 : vector<16x1xf32>
      %42 = math.rsqrt %41 : vector<16x1xf32>
      %43 = arith.mulf %42, %39 : vector<16x1xf32>
      %c0_23 = arith.constant 0 : index
      %44 = memref.load %arg6[%c0_23] : memref<1xf32, #tpu.memory_space<smem>>
      %45 = vector.broadcast %44 : f32 to vector<16x1xf32>
      %46 = arith.addf %43, %45 : vector<16x1xf32>
      %c0_24 = arith.constant 0 : index
      %c0_25 = arith.constant 0 : index
      %47 = vector.load %arg7[%c0_24, %c0_25] : memref<16x1xf32, #tpu.memory_space<vmem>>, vector<16x1xf32>
      tpu.vector_store %arg7[%c0_24, %c0_25], %46 {strides = array<i32>} : memref<16x1xf32, #tpu.memory_space<vmem>>, vector<16x1xf32>,
    } else {
    }
    return
  }
  func.func @transform_0(%arg0: i32, %arg1: i32) -> (i32, i32) {
    %c0_i32 = arith.constant 0 : i32
    return %arg0, %arg1 : i32, i32
  }
  func.func @transform_1(%arg0: i32, %arg1: i32) -> (i32, i32) {
    %c0_i32 = arith.constant 0 : i32
    %c0_i32_0 = arith.constant 0 : i32
    return %arg1, %c0_i32 : i32, i32
  }
  func.func @transform_2(%arg0: i32, %arg1: i32) -> (i32, i32) {
    %c0_i32 = arith.constant 0 : i32
    %c0_i32_0 = arith.constant 0 : i32
    %c0_i32_1 = arith.constant 0 : i32
    return %c0_i32, %c0_i32_0 : i32, i32
  }
  func.func @transform_3(%arg0: i32, %arg1: i32) -> (i32, i32) {
    %c0_i32 = arith.constant 0 : i32
    %c0_i32_0 = arith.constant 0 : i32
    %c0_i32_1 = arith.constant 0 : i32
    return %c0_i32, %c0_i32_0 : i32, i32
  }
  func.func @transform_4(%arg0: i32, %arg1: i32) -> i32 {
    %c0_i32 = arith.constant 0 : i32
    %c0_i32_0 = arith.constant 0 : i32
    return %c0_i32 : i32
  }
  func.func @transform_5(%arg0: i32, %arg1: i32) -> (i32, i32) {
    %c0_i32 = arith.constant 0 : i32
    %c0_i32_0 = arith.constant 0 : i32
    return %arg0, %c0_i32 : i32, i32
  }
}

</mosaic_0001>

<bundles_post_ra>
// kernel: tpu_custom_call.1
= control target key start
LH: loop header
LB: loop body
LE: loop exit
PB: predicated region body
PF: predicated region fallthrough
CT: control target
= control target key end

     0   :  { %11 = vsyncpa [#allocation5], 0  ;;  %s640_s0 = inlined_call_operand.hbm [shape: bf16[16,256], index: 0, kind: input, shape index: {}]   ;;  %s641_s1 = inlined_call_operand.hbm [shape: bf16[256,128], index: 1, kind: input, shape index: {}]   ;;  %s642_s2 = inlined_call_operand.vmem [shape: f32[1,128], index: 2, kind: input, shape index: {}]   ;;  %s643_s3 = inlined_call_operand.vmem [shape: f32[1,128], index: 3, kind: input, shape index: {}]   ;;  %s644_s4 = inlined_call_operand.<no memory space> [shape: f32[1], index: 4, kind: input, shape index: {}]   ;;  %s645_s5 = inlined_call_operand.vmem [shape: f32[16,1], index: 5, kind: output, shape index: {}]  }
   0x1   :  { %s17_s20 = sshll.u32 %s640_s0, 4  ;;  %s18_s20 = int_to_ptr.hbm [resolvable:$true] %s17_s20 }
   0x2   :  { %12 = vsyncpa [#allocation7], 0  ;;  %s569_s21 = smov [#allocation4]   ;;  %s30_s25 = sshll.u32 %s641_s1, 4  ;;  %s31_s25 = int_to_ptr.hbm [resolvable:$true] %s30_s25 }
   0x3   :  { %s19_s22 = sshll.u32 %s569_s21, 4  ;;  %s570_s26 = smov 128   ;;  %s20_s22 = int_to_ptr.vmem [resolvable:$true] %s19_s22 }
   0x4   :  { %s571_s27 = smov 8   ;;  %s572_s28 = smov [#allocation6]  }
   0x5   :  { %25 = dma.hbm_to_vmem [thread:$0]  %s18_s20, 256, %s20_s22, [#allocation5], %s570_s26, %s570_s26, %s571_s27  }
   0x6   :  { %s32_s29 = sshll.u32 %s572_s28, 4  ;;  %s573_s30 = smov 64   ;;  %s33_s29 = int_to_ptr.vmem [resolvable:$true] %s32_s29 }
   0x7   :  { %s574_s6 = smov 4  }
   0x8   :  { %38 = dma.hbm_to_vmem [thread:$0]  %s31_s25, 2048, %s33_s29, [#allocation7], %s573_s30, %s573_s30, %s574_s6  }
   0x9   :  { %565 = dma.done.wait [#allocation5], 256  }
   0xa   :  { %566 = vsyncadd [#allocation5], 4294967040 }
   0xb   :  { %567 = dma.done.wait [#allocation7], 2048  }
   0xc   :  { %568 = vsyncadd [#allocation7], 4294965248  ;;  %v489_v0 = vld [vmem:[#allocation6 + $0x38] sm:$0xff]  ;;  %v488_v2 = vld [vmem:[#allocation6 + $0x30] sm:$0xff]  ;;  %vm397_vm12 = vcmask 7168  }
   0xd   :  { %v497_v1 = vld [vmem:[#allocation6 + $0x78] sm:$0xff]  ;;  %193 = vmatpush.bf16.msra.mxu0 %v489_v0  ;;  %v496_v3 = vld [vmem:[#allocation6 + $0x70] sm:$0xff]  ;;  %v487_v4 = vld [vmem:[#allocation6 + $0x28] sm:$0xff] }
   0xe   :  { %207 = vmatpush.bf16.msra.mxu1 %v497_v1  ;;  %v495_v5 = vld [vmem:[#allocation6 + $0x68] sm:$0xff]  ;;  %v486_v6 = vld [vmem:[#allocation6 + $0x20] sm:$0xff]  ;;  %v485_v8 = vld [vmem:[#allocation6 + $0x18] sm:$0xff] }
   0xf   :  { %v494_v7 = vld [vmem:[#allocation6 + $0x60] sm:$0xff]  ;;  %v493_v9 = vld [vmem:[#allocation6 + $0x58] sm:$0xff]  ;;  %v484_v10 = vld [vmem:[#allocation6 + $0x10] sm:$0xff] }
  0x10   :  { %v492_v11 = vld [vmem:[#allocation6 + $0x50] sm:$0xff]  ;;  %v483_v12 = vld [vmem:[#allocation6 + $0x8] sm:$0xff]  ;;  %v482_v14 = vld [vmem:[#allocation6] sm:$0xff] }
  0x11   :  { %194 = vmatpush.bf16.msra.mxu0 %v488_v2  ;;  %v491_v13 = vld [vmem:[#allocation6 + $0x48] sm:$0xff]  ;;  %v490_v15 = vld [vmem:[#allocation6 + $0x40] sm:$0xff]  ;;  %v408_v16 = vld [vmem:[#allocation4] sm:$0xf] }
  0x12   :  { %208 = vmatpush.bf16.msra.mxu1 %v496_v3  ;;  %v481_v17 = vld [vmem:[#allocation4 + $0x4] sm:$0xf0]  ;;  %v480_v18 = vld [vmem:[#allocation4 + $0x4] sm:$0xf]  ;;  %v410_v19 = vld [vmem:[#allocation4 + $0x8] sm:$0xf0] }
  0x13   :  { %v409_v20 = vor.u32 %v481_v17, %v408_v16  ;;  %v413_v21 = vor.u32 %v480_v18, %v410_v19  ;;  %v505_v22 = vld [vmem:[%s642_s2] ss:$0 sm:$0xff] }
  0x15   :  { %195 = vmatpush.bf16.msra.mxu0 %v487_v4 }
  0x16   :  { %209 = vmatpush.bf16.msra.mxu1 %v495_v5 }
  0x19   :  { %196 = vmatpush.bf16.msra.mxu0 %v486_v6 }
  0x1a   :  { %210 = vmatpush.bf16.msra.mxu1 %v494_v7 }
  0x1d   :  { %197 = vmatpush.bf16.msra.mxu0 %v485_v8 }
  0x1e   :  { %211 = vmatpush.bf16.msra.mxu1 %v493_v9 }
  0x21   :  { %198 = vmatpush.bf16.msra.mxu0 %v484_v10 }
  0x22   :  { %212 = vmatpush.bf16.msra.mxu1 %v492_v11 }
  0x25   :  { %199 = vmatpush.bf16.msra.mxu0 %v483_v12 }
  0x26   :  { %213 = vmatpush.bf16.msra.mxu1 %v491_v13 }
  0x29   :  { %200 = vmatpush.bf16.msra.mxu0 %v482_v14 }
  0x2a   :  { %214 = vmatpush.bf16.msra.mxu1 %v490_v15 }
  0x2c   :  { %201 = vmatmul.bf16.vlgmr.msra.gmra.mxu0 %v409_v20 }
  0x2d   :  { %215 = vmatmul.bf16.vlgmr.msra.gmra.mxu1 %v413_v21 }
  0xa9   :  { %v202_v23 = vpop.f32.mrf.mxu0 }
  0xaa   :  { %v216_v24 = vpop.f32.mrf.mxu1 }
  0xab   :  { %v217_v25 = vadd.f32 %v216_v24, %v202_v23 }
  0xad   :  { %v615_v26 = vadd.f32 %v505_v22, %v217_v25 }
  0xaf   :  { %v250_v27 = vmul.f32 0.70710677, %v615_v26 }
  0xb1   :  { %v252_v28 = vmul.f32 %v250_v27, %v250_v27  ;;  %v204_v29 = vpop.f32.mrf.mxu0 }
  0xb2   :  { %v218_v30 = vpop.f32.mrf.mxu1 }
  0xb3   :  { %v253_v31 = vmin.f32 %v252_v28, 16.0  ;;  %v219_v32 = vadd.f32 %v218_v30, %v204_v29 }
  0xb5   :  { %v618_v33 = vadd.f32 %v505_v22, %v219_v32  ;;  %v254_v34 = vmul.f32 2.1237322e-06, %v253_v31  ;;  %v265_v35 = vmul.f32 3.8918573e-05, %v253_v31 }
  0xb7   :  { %v621_v36 = vmul.f32 0.70710677, %v618_v33  ;;  %v255_v37 = vadd.f32 0.00028619796, %v254_v34  ;;  %v266_v38 = vadd.f32 0.001143296, %v265_v35 }
  0xb8   :  { %v248_v35 = vmul.f32 0.5, %v615_v26  ;;  %v575_v26 = vmov 128.0  }
  0xb9   :  { %v292_v39 = vmul.f32 %v621_v36, %v621_v36  ;;  %v256_v40 = vmul.f32 %v255_v37, %v253_v31  ;;  %v267_v41 = vmul.f32 %v266_v38, %v253_v31 }
  0xbb   :  { %v293_v42 = vmin.f32 %v292_v39, 16.0  ;;  %v268_v43 = vadd.f32 0.014752088, %v267_v41  ;;  %v257_v44 = vadd.f32 0.0036580483, %v256_v40 }
  0xbd   :  { %v269_v45 = vmul.f32 %v268_v43, %v253_v31  ;;  %v294_v46 = vmul.f32 2.1237322e-06, %v293_v42  ;;  %v305_v47 = vmul.f32 3.8918573e-05, %v293_v42  ;;  %v258_v50 = vmul.f32 %v257_v44, %v253_v31 }
  0xbf   :  { %v270_v48 = vadd.f32 0.112945676, %v269_v45  ;;  %v295_v49 = vadd.f32 0.00028619796, %v294_v46  ;;  %v306_v51 = vadd.f32 0.001143296, %v305_v47 }
  0xc0   :  { %v259_v56 = vadd.f32 0.05243302, %v258_v50  ;;  %v249_v45 = vmul.f32 0.5, %v618_v33 }
  0xc1   :  { %v271_v52 = vmul.f32 %v270_v48, %v253_v31  ;;  %v296_v53 = vmul.f32 %v295_v49, %v293_v42  ;;  %v307_v54 = vmul.f32 %v306_v51, %v293_v42 }
  0xc2   :  { %v260_v62 = vmul.f32 %v259_v56, %v253_v31 }
  0xc3   :  { %v272_v55 = vadd.f32 0.4994258, %v271_v52  ;;  %v308_v57 = vadd.f32 0.014752088, %v307_v54  ;;  %v297_v59 = vadd.f32 0.0036580483, %v296_v53 }
  0xc4   :  { %v261_v2 = vadd.f32 0.18741608, %v260_v62 }
  0xc5   :  { %v273_v58 = vmul.f32 %v272_v55, %v253_v31  ;;  %v309_v60 = vmul.f32 %v308_v57, %v293_v42  ;;  %v298_v0 = vmul.f32 %v297_v59, %v293_v42  ;;  %v506_v55 = vld [vmem:[%s643_s3] ss:$0 sm:$0xff] }
  0xc6   :  { %v262_v7 = vmul.f32 %v261_v2, %v253_v31 }
  0xc7   :  { %v274_v61 = vadd.f32 1.0, %v273_v58  ;;  %v310_v63 = vadd.f32 0.112945676, %v309_v60  ;;  %v299_v4 = vadd.f32 0.05243302, %v298_v0 }
  0xc8   :  { %v263_v13 = vadd.f32 1.1283791, %v262_v7 }
  0xc9   :  { %507 = vrcp.f32 %v274_v61  ;;  %v311_v1 = vmul.f32 %v310_v63, %v293_v42  ;;  %v300_v10 = vmul.f32 %v299_v4, %v293_v42  ;;  %v286_v12 = vand.u32 2147483648, %v274_v61 }
  0xca   :  { %v284_v15 = vand.u32 2147483647, %v274_v61  ;;  %vm280_vm1 = vweird.f32 %v274_v61  ;;  %v264_v20 = vmul.f32 %v263_v13, %v250_v27 }
  0xcb   :  { %v312_v3 = vadd.f32 0.4994258, %v311_v1  ;;  %v301_v16 = vadd.f32 0.18741608, %v300_v10  ;;  %v287_v18 = vor.u32 1.1754944e-38, %v286_v12 }
  0xcc   :  { %vm285_vm3 = vcmp.eq.f32.partialorder %v284_v15, 8.507059e+37 }
  0xcd   :  { %v313_v5 = vmul.f32 %v312_v3, %v293_v42  ;;  %v302_v23 = vmul.f32 %v301_v16, %v293_v42 }
  0xcf   :  { %v508_v6 = vpop.eup %507  ;;  %v314_v9 = vadd.f32 1.0, %v313_v5  ;;  %v303_v31 = vadd.f32 1.1283791, %v302_v23 }
  0xd0   :  { %v276_v8 = vmul.f32 %v508_v6, %v274_v61  ;;  %vm281_vm0 = vweird.f32 %v508_v6 }
  0xd1   :  { %509 = vrcp.f32 %v314_v9  ;;  %vm282_vm2 = vmor %vm280_vm1, %vm281_vm0  ;;  %v326_v30 = vand.u32 2147483648, %v314_v9  ;;  %v324_v34 = vand.u32 2147483647, %v314_v9  ;;  %vm320_vm5 = vweird.f32 %v314_v9 }
  0xd2   :  { %v277_v11 = vsub.f32 1.0, %v276_v8  ;;  %v304_v40 = vmul.f32 %v303_v31, %v621_v36  ;;  %511 = vrcp.f32 %v575_v26 }
  0xd3   :  { %v327_v27 = vor.u32 1.1754944e-38, %v326_v30  ;;  %vm325_vm7 = vcmp.eq.f32.partialorder %v324_v34, 8.507059e+37 }
  0xd4   :  { %v278_v14 = vmul.f32 %v508_v6, %v277_v11 }
  0xd6   :  { %v279_v17 = vadd.f32 %v508_v6, %v278_v14  ;;  %v394_v14 = vstv %s644_s4 }
  0xd7   :  { %v510_v19 = vpop.eup %509 }
  0xd8   :  { %v283_v21 = vsel %vm282_vm2, %v508_v6, %v279_v17  ;;  %v316_v24 = vmul.f32 %v510_v19, %v314_v9  ;;  %vm321_vm4 = vweird.f32 %v510_v19  ;;  %v512_v48 = vpop.eup %511 }
  0xd9   :  { %v288_v22 = vsel %vm285_vm3, %v287_v18, %v283_v21  ;;  %vm322_vm6 = vmor %vm320_vm5, %vm321_vm4  ;;  %v341_v49 = vmul.f32 128.0, %v512_v48  ;;  %vm345_vm8 = vweird.f32 %v512_v48 }
  0xda   :  { %v289_v25 = vmul.f32 %v288_v22, %v264_v20  ;;  %v317_v28 = vsub.f32 1.0, %v316_v24 }
  0xdb   :  { %v342_v50 = vsub.f32 1.0, %v341_v49 }
  0xdc   :  { %v478_v29 = vclamps-f32 %v289_v25, 1.0  ;;  %v318_v32 = vmul.f32 %v510_v19, %v317_v28 }
  0xdd   :  { %v343_v51 = vmul.f32 %v512_v48, %v342_v50 }
  0xde   :  { %v332_v37 = vadd.f32 1.0, %v478_v29  ;;  %v319_v38 = vadd.f32 %v510_v19, %v318_v32 }
  0xdf   :  { %v344_v52 = vadd.f32 %v512_v48, %v343_v51 }
  0xe0   :  { %v334_v39 = vmul.f32 %v332_v37, %v248_v35  ;;  %v323_v41 = vsel %vm322_vm6, %v510_v19, %v319_v38 }
  0xe1   :  { %v328_v42 = vsel %vm325_vm7, %v327_v27, %v323_v41  ;;  %v346_v36 = vsel %vm345_vm8, %v512_v48, %v344_v52 }
  0xe2   :  { %336 = vadd.xlane.f32.xlu0 %v334_v39  ;;  %v329_v43 = vmul.f32 %v328_v42, %v304_v40 }
  0xe4   :  { %v479_v44 = vclamps-f32 %v329_v43, 1.0 }
  0xe6   :  { %v333_v46 = vadd.f32 1.0, %v479_v44 }
  0xe8   :  { %v335_v47 = vmul.f32 %v333_v46, %v249_v45 }
  0xea   :  { %338 = vadd.xlane.f32.xlu0 %v335_v47 }
 0x155   :  { %v337_v53 = vpop.xlane.xlu0 %336 }
 0x156   :  { %v347_v54 = vmul.f32 %v346_v36, %v337_v53 }
 0x158   :  { %v349_v56 = vsub.f32 %v334_v39, %v347_v54 }
 0x15a   :  { %v363_v33 = vmul.f32 %v506_v55, %v349_v56  ;;  %v351_v57 = vmul.f32 %v349_v56, %v349_v56 }
 0x15c   :  { %365 = vadd.xlane.f32.xlu2 %v363_v33  ;;  %353 = vadd.xlane.f32.xlu1 %v351_v57 }
 0x15d   :  { %v339_v58 = vpop.xlane.xlu0 %338 }
 0x15e   :  { %v348_v59 = vmul.f32 %v346_v36, %v339_v58 }
 0x160   :  { %v350_v60 = vsub.f32 %v335_v47, %v348_v59 }
 0x162   :  { %v364_v61 = vmul.f32 %v506_v55, %v350_v60  ;;  %v352_v62 = vmul.f32 %v350_v60, %v350_v60 }
 0x164   :  { %367 = vadd.xlane.f32.xlu2 %v364_v61  ;;  %355 = vadd.xlane.f32.xlu1 %v352_v62 }
 0x1cf   :  { %v354_v63 = vpop.xlane.xlu1 %353  ;;  %v366_v12 = vpop.xlane.xlu2 %365 }
 0x1d0   :  { %v357_v0 = vmul.f32 %v354_v63, %v346_v36 }
 0x1d2   :  { %v369_v1 = vadd.f32 1e-12, %v357_v0 }
 0x1d4   :  { %513 = vrsqrt.f32 %v369_v1  ;;  %vm377_vm10 = vweird.f32 %v369_v1 }
 0x1d7   :  { %v356_v2 = vpop.xlane.xlu1 %355  ;;  %v368_v22 = vpop.xlane.xlu2 %367 }
 0x1d8   :  { %v358_v3 = vmul.f32 %v356_v2, %v346_v36 }
 0x1da   :  { %v514_v4 = vpop.eup %513  ;;  %v370_v6 = vadd.f32 1e-12, %v358_v3 }
 0x1db   :  { %v372_v5 = vmul.f32 %v514_v4, %v369_v1  ;;  %vm378_vm9 = vweird.f32 %v514_v4 }
 0x1dc   :  { %515 = vrsqrt.f32 %v370_v6  ;;  %vm379_vm11 = vmor %vm377_vm10, %vm378_vm9  ;;  %vm387_vm14 = vweird.f32 %v370_v6 }
 0x1dd   :  { %v373_v7 = vmul.f32 %v514_v4, %v372_v5 }
 0x1df   :  { %v374_v8 = vmul.f32 0.5, %v373_v7 }
 0x1e1   :  { %v375_v9 = vsub.f32 1.5, %v374_v8 }
 0x1e2   :  { %v516_v10 = vpop.eup %515 }
 0x1e3   :  { %v376_v11 = vmul.f32 %v514_v4, %v375_v9  ;;  %v382_v13 = vmul.f32 %v516_v10, %v370_v6  ;;  %vm388_vm13 = vweird.f32 %v516_v10 }
 0x1e4   :  { %vm389_vm15 = vmor %vm387_vm14, %vm388_vm13 }
 0x1e5   :  { %v380_v15 = vsel %vm379_vm11, %v514_v4, %v376_v11  ;;  %v383_v17 = vmul.f32 %v516_v10, %v382_v13 }
 0x1e6   :  { %v391_v16 = vmul.f32 %v380_v15, %v366_v12 }
 0x1e7   :  { %v384_v19 = vmul.f32 0.5, %v383_v17 }
 0x1e8   :  { %v395_v18 = vadd.f32 %v394_v14, %v391_v16 }
 0x1e9   :  { %v385_v20 = vsub.f32 1.5, %v384_v19 }
 0x1ea   :  { %398 = vst.msk [vmem:[%s645_s5] sm:$0xff] %vm397_vm12, %v395_v18 }
 0x1eb   :  { %v386_v21 = vmul.f32 %v516_v10, %v385_v20 }
 0x1ed   :  { %v390_v23 = vsel %vm389_vm15, %v516_v10, %v386_v21 }
 0x1ee   :  { %v392_v24 = vmul.f32 %v390_v23, %v368_v22 }
 0x1f0   :  { %v396_v25 = vadd.f32 %v394_v14, %v392_v24 }
 0x1f2   :  { %399 = vst.msk [vmem:[%s645_s5 + $0x8] sm:$0xff] %vm397_vm12, %v396_v25 }
 0x1f3   :  { %404 = vsyncpa [#allocation5], 1 }
 0x1f4   :  { %405 = vsyncpa [#allocation7], 1 }

</bundles_post_ra>
